<compile_context>
chip_gen: v7x
topology: tpu7x:2x2x1
jax: 0.10.0
libtpu: 0.0.40
codegen_flags: <defaults>
</compile_context>

<pallas_src>
import jax
import jax.numpy as jnp
from jax import lax
from jax.experimental import pallas as pl
from jax.experimental.pallas import tpu as pltpu


# ----------------------------- problem sizes -----------------------------
B = 2          # batch
C_IN = 32      # channels entering the final 1x1 conv (stand-in for 512)
C_FEAT = 64    # feature channels (stand-in for 2048)
H = 8
W = 8
HW = H * W
N_CLASSES = 16


# ------------------------------- kernel ----------------------------------
def cam_head_kernel(x_ref, weff_ref, cams_ref, probs_ref):
    """Single grid step, whole batch fused.

    x_ref    : (B, C_IN, HW)        activations entering conv3 (free reshape of NCHW)
    weff_ref : (N_CLASSES, C_IN)    folded weight  W_eff = linear_w @ conv3_w
    cams_ref : (B, N_CLASSES, HW)   per-pixel class activation maps (NCHW-ready)
    probs_ref: (B, N_CLASSES)       softmax probabilities (final layout, no wrapper .T)
    """
    x = x_ref[...]                                   # (B, C_IN, HW)
    weff = weff_ref[...]                             # (N_CLASSES, C_IN)
    inv_hw = 1.0 / float(W * W)                      # H == W  ==>  1/W**2 == 1/HW

    # CAMs: one MXU pass per image (B is tiny & static -> unrolled), written
    # directly in (B, N, HW) order so the wrapper reshape to NCHW is free.
    for b in range(B):
        cams_ref[b] = jnp.dot(
            weff, x[b], preferred_element_type=jnp.float32) * inv_hw   # (N, HW)

    # Logits: spatial sum folded before the matmul.  Exact in this reduced
    # scope (conv3 output, bn3/relu == Identity, no residual) — the same
    # identity the PyTorch module asserts (logits ~= cams.sum(spatial)).
    # TODO(synk): with the real backbone attached (residual add into the
    # pooled feature) logits must come from the pooled-feature matmul instead.
    x_sum = jnp.sum(x, axis=-1)                      # (B, C_IN)
    logits = lax.dot_general(
        x_sum, weff,
        dimension_numbers=(((1,), (1,)), ((), ())),
        preferred_element_type=jnp.float32,
    ) * inv_hw                                       # (B, N_CLASSES)

    # Softmax over the class axis (eval mode, not multilabel).
    m = jnp.max(logits, axis=1, keepdims=True)
    e = jnp.exp(logits - m)
    denom = jnp.sum(e, axis=1, keepdims=True)
    r = pl.reciprocal(denom, approx=True)            # EUP slot (free)
    r = r * (2.0 - denom * r)                        # Newton refine ->
    r = r * (2.0 - denom * r)                        #   full f32 accuracy
    probs_ref[...] = e * r


# ------------------------------- wrapper ----------------------------------
def model_forward(x_nchw, conv3_w, linear_w):
    """x_nchw: (B, C_IN, H, W) float32  (PyTorch NCHW convention at the boundary).

    Returns (probs, cams) matching the PyTorch forward:
      probs: (B, N_CLASSES)
      cams : (B, N_CLASSES, H, W)
    """
    # Fold the 1x1 conv (layer4[-1].conv3 analogue) into the classifier:
    # conv3_w is (C_FEAT, C_IN, 1, 1); W_eff = linear_w @ w3 -> (N_CLASSES, C_IN).
    w_eff = jnp.dot(linear_w, conv3_w.reshape(C_FEAT, C_IN))
    # NCHW -> (B, C_IN, HW): contiguous (free) reshape, no transpose op.
    x_flat = x_nchw.reshape(B, C_IN, HW)

    cams_bnp, probs = pl.pallas_call(
        cam_head_kernel,
        out_shape=(
            jax.ShapeDtypeStruct((B, N_CLASSES, HW), jnp.float32),
            jax.ShapeDtypeStruct((B, N_CLASSES), jnp.float32),
        ),
        grid=(1,),
        in_specs=[
            pl.BlockSpec((B, C_IN, HW), lambda i: (0, 0, 0)),
            pl.BlockSpec((N_CLASSES, C_IN), lambda i: (0, 0)),
        ],
        out_specs=(
            pl.BlockSpec((B, N_CLASSES, HW), lambda i: (0, 0, 0)),
            pl.BlockSpec((B, N_CLASSES), lambda i: (0, 0)),
        ),
        compiler_params=pltpu.CompilerParams(
            dimension_semantics=("arbitrary",),
        ),
        cost_estimate=pl.CostEstimate(
            flops=2 * B * N_CLASSES * C_IN * HW + 2 * B * N_CLASSES * C_IN,
            transcendentals=B * N_CLASSES + B,
            bytes_accessed=4 * (B * C_IN * HW + N_CLASSES * C_IN
                                + B * N_CLASSES * HW + B * N_CLASSES),
        ),
    )(x_flat, w_eff)

    cams = cams_bnp.reshape(B, N_CLASSES, H, W)      # free reshape, NCHW cams
    return probs, cams


# ------------------------------ reference ---------------------------------
def model_forward_ref(x_nchw, conv3_w, linear_w):
    x_cl = jnp.transpose(x_nchw, (0, 2, 3, 1)).reshape(B, HW, C_IN)
    w3 = jnp.transpose(conv3_w.reshape(C_FEAT, C_IN), (1, 0))
    f = jnp.einsum("bpc,cf->bpf", x_cl, w3)                       # feature_rect
    pooled = jnp.mean(f, axis=1)                                  # (B, C_FEAT)
    logits = pooled @ linear_w.T                                  # (B, N)
    probs = jax.nn.softmax(logits, axis=1)
    cams = jnp.einsum("nf,bpf->bnp", linear_w, f) / (W * W)
    return probs, cams.reshape(B, N_CLASSES, H, W)


# -------------------------------- main -------------------------------------
if __name__ == "__main__":
    key = jax.random.PRNGKey(0)
    k_x, k_w3, k_wl = jax.random.split(key, 3)

    x = jax.random.normal(k_x, (B, C_IN, H, W), dtype=jnp.float32)
    conv3_w = jax.random.normal(k_w3, (C_FEAT, C_IN, 1, 1), dtype=jnp.float32) * 0.05
    linear_w = jax.random.normal(k_wl, (N_CLASSES, C_FEAT), dtype=jnp.float32) * 0.05

    probs, cams = jax.jit(model_forward)(x, conv3_w, linear_w)
    jax.block_until_ready((probs, cams))

    probs_ref, cams_ref = model_forward_ref(x, conv3_w, linear_w)
    assert probs.shape == (B, N_CLASSES) and cams.shape == (B, N_CLASSES, H, W)
    assert jnp.allclose(probs, probs_ref, atol=1e-5), "probs mismatch"
    assert jnp.allclose(cams, cams_ref, atol=1e-5), "cams mismatch"

    # sanity: cam_logits (sum over spatial) should reproduce logits (contrastive check)
    cam_logits = cams.reshape(B, N_CLASSES, -1).sum(-1)
    _ = jax.block_until_ready(cam_logits)

    print("KERNEL_OK")
</pallas_src>

<mosaic_0001>
module attributes {stable_mosaic.version = 11 : i64} {
  func.func @cam_head_kernel(%arg0: i32, %arg1: memref<2x32x64xf32, #tpu.memory_space<vmem>>, %arg2: memref<16x32xf32, #tpu.memory_space<vmem>>, %arg3: memref<2x16x64xf32, #tpu.memory_space<vmem>>, %arg4: memref<2x16xf32, #tpu.memory_space<vmem>>) attributes {dimension_semantics = [#tpu.dimension_semantics<arbitrary>], iteration_bounds = array<i64: 1>, scalar_prefetch = 0 : i64, scratch_operands = 0 : i64, tpu.core_type = #tpu.core_type<tc>, window_params = [{pipeline_mode = #tpu.pipeline_mode<synchronous>, transform_indices = @transform_0, window_bounds = array<i64: 2, 32, 64>}, {pipeline_mode = #tpu.pipeline_mode<synchronous>, transform_indices = @transform_1, window_bounds = array<i64: 16, 32>}, {pipeline_mode = #tpu.pipeline_mode<synchronous>, transform_indices = @transform_2, window_bounds = array<i64: 2, 16, 64>}, {pipeline_mode = #tpu.pipeline_mode<synchronous>, transform_indices = @transform_3, window_bounds = array<i64: 2, 16>}]} {
    %c0 = arith.constant 0 : index
    %c0_0 = arith.constant 0 : index
    %c0_1 = arith.constant 0 : index
    %0 = vector.load %arg1[%c0, %c0_0, %c0_1] : memref<2x32x64xf32, #tpu.memory_space<vmem>>, vector<2x32x64xf32>
    %c0_2 = arith.constant 0 : index
    %c0_3 = arith.constant 0 : index
    %1 = vector.load %arg2[%c0_2, %c0_3] : memref<16x32xf32, #tpu.memory_space<vmem>>, vector<16x32xf32>
    %2 = vector.extract_strided_slice %0 {offsets = [0, 0, 0], sizes = [1, 32, 64], strides = [1, 1, 1]} : vector<2x32x64xf32> to vector<1x32x64xf32>
    %3 = vector.shape_cast %2 : vector<1x32x64xf32> to vector<32x64xf32>
    %cst = arith.constant dense<0.000000e+00> : vector<16x64xf32>
    %4 = tpu.matmul %1, %3, %cst {dimension_numbers = #tpu.dot_dimension_numbers<[1], [0], [0], [1], [0, 0, 1, 1], [], []>} : vector<16x32xf32>, vector<32x64xf32>, vector<16x64xf32> -> vector<16x64xf32>
    %cst_4 = arith.constant 1.562500e-02 : f32
    %5 = vector.broadcast %cst_4 : f32 to vector<16x64xf32>
    %6 = arith.mulf %4, %5 : vector<16x64xf32>
    %c0_5 = arith.constant 0 : index
    %c0_6 = arith.constant 0 : index
    %c0_7 = arith.constant 0 : index
    %7 = vector.load %arg3[%c0_5, %c0_6, %c0_7] : memref<2x16x64xf32, #tpu.memory_space<vmem>>, vector<1x16x64xf32>
    %8 = vector.shape_cast %7 : vector<1x16x64xf32> to vector<16x64xf32>
    %9 = vector.shape_cast %6 : vector<16x64xf32> to vector<1x16x64xf32>
    tpu.vector_store %arg3[%c0_5, %c0_6, %c0_7], %9 {strides = array<i32>} : memref<2x16x64xf32, #tpu.memory_space<vmem>>, vector<1x16x64xf32>,
    %10 = vector.extract_strided_slice %0 {offsets = [1, 0, 0], sizes = [1, 32, 64], strides = [1, 1, 1]} : vector<2x32x64xf32> to vector<1x32x64xf32>
    %11 = vector.shape_cast %10 : vector<1x32x64xf32> to vector<32x64xf32>
    %cst_8 = arith.constant dense<0.000000e+00> : vector<16x64xf32>
    %12 = tpu.matmul %1, %11, %cst_8 {dimension_numbers = #tpu.dot_dimension_numbers<[1], [0], [0], [1], [0, 0, 1, 1], [], []>} : vector<16x32xf32>, vector<32x64xf32>, vector<16x64xf32> -> vector<16x64xf32>
    %cst_9 = arith.constant 1.562500e-02 : f32
    %13 = vector.broadcast %cst_9 : f32 to vector<16x64xf32>
    %14 = arith.mulf %12, %13 : vector<16x64xf32>
    %c1 = arith.constant 1 : index
    %c0_10 = arith.constant 0 : index
    %c0_11 = arith.constant 0 : index
    %15 = vector.load %arg3[%c1, %c0_10, %c0_11] : memref<2x16x64xf32, #tpu.memory_space<vmem>>, vector<1x16x64xf32>
    %16 = vector.shape_cast %15 : vector<1x16x64xf32> to vector<16x64xf32>
    %17 = vector.shape_cast %14 : vector<16x64xf32> to vector<1x16x64xf32>
    tpu.vector_store %arg3[%c1, %c0_10, %c0_11], %17 {strides = array<i32>} : memref<2x16x64xf32, #tpu.memory_space<vmem>>, vector<1x16x64xf32>,
    %cst_12 = arith.constant dense<0.000000e+00> : vector<2x32xf32>
    %18 = vector.multi_reduction <add>, %0, %cst_12 [2] : vector<2x32x64xf32> to vector<2x32xf32>
    %cst_13 = arith.constant dense<0.000000e+00> : vector<2x16xf32>
    %19 = tpu.matmul %18, %1, %cst_13 {dimension_numbers = #tpu.dot_dimension_numbers<[1], [1], [0], [0], [0, 0, 1, 0], [], []>} : vector<2x32xf32>, vector<16x32xf32>, vector<2x16xf32> -> vector<2x16xf32>
    %cst_14 = arith.constant 1.562500e-02 : f32
    %20 = vector.broadcast %cst_14 : f32 to vector<2x16xf32>
    %21 = arith.mulf %19, %20 : vector<2x16xf32>
    %cst_15 = arith.constant dense<0xFF800000> : vector<2xf32>
    %22 = vector.multi_reduction <maximumf>, %21, %cst_15 [1] : vector<2x16xf32> to vector<2xf32>
    %23 = vector.shape_cast %22 : vector<2xf32> to vector<2x1xf32>
    %24 = vector.broadcast %23 : vector<2x1xf32> to vector<2x16xf32>
    %25 = arith.subf %21, %24 : vector<2x16xf32>
    %26 = math.exp %25 : vector<2x16xf32>
    %cst_16 = arith.constant dense<0.000000e+00> : vector<2xf32>
    %27 = vector.multi_reduction <add>, %26, %cst_16 [1] : vector<2x16xf32> to vector<2xf32>
    %28 = vector.shape_cast %27 : vector<2xf32> to vector<2x1xf32>
    %29 = tpu.reciprocal %28 {approx = true} : vector<2x1xf32> -> vector<2x1xf32>
    %30 = arith.mulf %28, %29 : vector<2x1xf32>
    %cst_17 = arith.constant 2.000000e+00 : f32
    %31 = vector.broadcast %cst_17 : f32 to vector<2x1xf32>
    %32 = arith.subf %31, %30 : vector<2x1xf32>
    %33 = arith.mulf %29, %32 : vector<2x1xf32>
    %34 = arith.mulf %28, %33 : vector<2x1xf32>
    %cst_18 = arith.constant 2.000000e+00 : f32
    %35 = vector.broadcast %cst_18 : f32 to vector<2x1xf32>
    %36 = arith.subf %35, %34 : vector<2x1xf32>
    %37 = arith.mulf %33, %36 : vector<2x1xf32>
    %38 = vector.broadcast %37 : vector<2x1xf32> to vector<2x16xf32>
    %39 = arith.mulf %26, %38 : vector<2x16xf32>
    %c0_19 = arith.constant 0 : index
    %c0_20 = arith.constant 0 : index
    %40 = vector.load %arg4[%c0_19, %c0_20] : memref<2x16xf32, #tpu.memory_space<vmem>>, vector<2x16xf32>
    tpu.vector_store %arg4[%c0_19, %c0_20], %39 {strides = array<i32>} : memref<2x16xf32, #tpu.memory_space<vmem>>, vector<2x16xf32>,
    return
  }
  func.func @transform_0(%arg0: i32) -> (i32, i32, i32) {
    %c0_i32 = arith.constant 0 : i32
    %c0_i32_0 = arith.constant 0 : i32
    %c0_i32_1 = arith.constant 0 : i32
    %c0_i32_2 = arith.constant 0 : i32
    return %c0_i32, %c0_i32_0, %c0_i32_1 : i32, i32, i32
  }
  func.func @transform_1(%arg0: i32) -> (i32, i32) {
    %c0_i32 = arith.constant 0 : i32
    %c0_i32_0 = arith.constant 0 : i32
    %c0_i32_1 = arith.constant 0 : i32
    return %c0_i32, %c0_i32_0 : i32, i32
  }
  func.func @transform_2(%arg0: i32) -> (i32, i32, i32) {
    %c0_i32 = arith.constant 0 : i32
    %c0_i32_0 = arith.constant 0 : i32
    %c0_i32_1 = arith.constant 0 : i32
    %c0_i32_2 = arith.constant 0 : i32
    return %c0_i32, %c0_i32_0, %c0_i32_1 : i32, i32, i32
  }
  func.func @transform_3(%arg0: i32) -> (i32, i32) {
    %c0_i32 = arith.constant 0 : i32
    %c0_i32_0 = arith.constant 0 : i32
    %c0_i32_1 = arith.constant 0 : i32
    return %c0_i32, %c0_i32_0 : i32, i32
  }
}

</mosaic_0001>

<bundles_post_ra>
// kernel: model_forward.1
= control target key start
LH: loop header
LB: loop body
LE: loop exit
PB: predicated region body
PF: predicated region fallthrough
CT: control target
= control target key end

     0   :  { %vm108_vm0 = vcmask 523264   ;;  %s598_s0 = inlined_call_operand.vmem [shape: f32[2,32,64], index: 0, kind: input, shape index: {}]   ;;  %s599_s1 = inlined_call_operand.vmem [shape: f32[16,32], index: 1, kind: input, shape index: {}]   ;;  %s600_s2 = inlined_call_operand.vmem [shape: f32[2,16,64], index: 2, kind: output, shape index: {0}]   ;;  %s601_s3 = inlined_call_operand.hbm [shape: f32[2,16], index: 3, kind: output, shape index: {1}]  }
   0x1   :  { %v513_v0 = vld [vmem:[%s598_s0 + $0x20] sm:$0xff]  ;;  %v521_v2 = vld [vmem:[%s598_s0 + $0x28] sm:$0xff]  ;;  %v20_v6 = vld [vmem:[%s598_s0 + $0x30] sm:$0xff] }
   0x2   :  { %v14_v1 = vld [vmem:[%s598_s0] sm:$0xff]  ;;  %v203_v3 = vsel %vm108_vm0, %v513_v0, 0.0  ;;  %v15_v5 = vld [vmem:[%s598_s0 + $0x8] sm:$0xff]  ;;  %v16_v7 = vld [vmem:[%s598_s0 + $0x10] sm:$0xff]  ;;  %v206_v11 = vsel %vm108_vm0, %v521_v2, 0.0 }
   0x3   :  { %v191_v4 = vsel %vm108_vm0, %v14_v1, 0.0  ;;  %204 = vadd.xlane.f32.xlu1 %v203_v3  ;;  %v21_v8 = vld [vmem:[%s598_s0 + $0x38] sm:$0xff]  ;;  %v434_v10 = vpack.c.bf16 %v15_v5, %v14_v1  ;;  %v194_v12 = vsel %vm108_vm0, %v15_v5, 0.0 }
   0x4   :  { %192 = vadd.xlane.f32.xlu0 %v191_v4  ;;  %v17_v9 = vld [vmem:[%s598_s0 + $0x18] sm:$0xff]  ;;  %v544_v13 = vpack.c.bf16 %v21_v8, %v20_v6 }
   0x5   :  { %v438_v14 = vpack.c.bf16 %v17_v9, %v16_v7 }
   0x6   :  { %9 = vsyncpa [#allocation3], 0  ;;  %435 = vmatprep.subr.bf16.mxu0 %v434_v10  ;;  %v209_v15 = vsel %vm108_vm0, %v20_v6, 0.0  ;;  %v197_v16 = vsel %vm108_vm0, %v16_v7, 0.0  ;;  %v212_v17 = vsel %vm108_vm0, %v21_v8, 0.0  ;;  %v200_v18 = vsel %vm108_vm0, %v17_v9, 0.0 }
   0x7   :  { %437 = vmatpush3.bf16.msra.mxu0 %v434_v10  ;;  %207 = vadd.xlane.f32.xlu1 %v206_v11  ;;  %v22_v19 = vld [vmem:[%s599_s1] sm:$0xff]  ;;  %vm24_vm1 = vcmask 261120   ;;  %v23_v20 = vld [vmem:[%s599_s1 + $0x8] sm:$0xff]  ;;  %v486_v22 = vmov 0.0|0.0   ;;  %vm487_vm3 = vmmov 0   ;;  %v488_v23 = vmov 0.0  }
   0x8   :  { %195 = vadd.xlane.f32.xlu0 %v194_v12  ;;  %439 = vmatprep.subr.bf16.mxu0 %v438_v14  ;;  %v451_v21 = vpack.c.bf16 %v23_v20, %v22_v19  ;;  %vm452_vm2 = vmpackc.low %vm24_vm1, %vm24_vm1  ;;  %v223_v24 = vlaneseq  ;;  %vm234_vm4 = vcmask 130112   ;;  %vm241_vm5 = vcmask 195712   ;;  %s489_s11 = smov [#allocation2]  }
   0x9   :  { %413 = vmatprep.mubr.msk.f32.mxu0 %vm24_vm1, %v22_v19  ;;  %424 = vmatprep.mubr.msk.f32.mxu1 %vm24_vm1, %v22_v19  ;;  %vm248_vm6 = vcmask 261312   ;;  %vm269_vm7 = vcmask 1041409   ;;  %v442_v61 = vpack.c.bf16 %v521_v2, %v513_v0  ;;  %vm344_vm8 = vcmask 123904   ;;  %s371_s12 = sshll.u32 %s489_s11, 4  ;;  %s372_s12 = int_to_ptr.vmem [resolvable:$true] %s371_s12 }
   0xa   :  { %v224_v25 = vand.u32 127, %v223_v24  ;;  %v226_v30 = vshrl.u32 %v223_v24, 7  ;;  %s462_s13 = scalar_lea.vmem %s372_s12, 32  ;;  %p467_p1 = scmp.lt.s32.totalorder %s372_s12, %s372_s12 }
   0xb   :  { %441 = vmatpush3.bf16.msra.mxu0 %v438_v14  ;;  %210 = vadd.xlane.f32.xlu1 %v209_v15  ;;  %p463_p0 = scmp.ne.s32.totalorder %s372_s12, %s462_s13  ;;  %p468_p2 = scmp.lt.s32.totalorder %s462_s13, %s462_s13 }
   0xc   :  { %198 = vadd.xlane.f32.xlu0 %v197_v16  ;;  %450 = vmatprep.subr.bf16.mxu0 %v486_v22  ;;  %v229_v28 = vadd.s32 4294967288, %v224_v25  ;;  %v236_v29 = vadd.s32 4294967280, %v224_v25  ;;  %v243_v34 = vadd.s32 4294967272, %v224_v25  ;;  %v227_v36 = vsub.s32 %v224_v25, %v226_v30 }
   0xd   :  { %443 = vmatprep.subr.bf16.mxu1 %v442_v61  ;;  %p469_p3 = por %p468_p2, %p467_p1 }
   0xe   :  { %414 = vmatmul.mubr.msk.f32.vlgmr.msra.gmra.mrb[0].mxu0 %vm24_vm1, %v23_v20  ;;  %v232_v33 = vsub.s32 %v229_v28, %v226_v30  ;;  %v239_v35 = vsub.s32 %v236_v29, %v226_v30  ;;  %v246_v41 = vsub.s32 %v243_v34, %v226_v30  ;;  %445 = vmatpush3.bf16.msra.mxu1 %v442_v61 }
   0xf   :  { %213 = vadd.xlane.f32.xlu1 %v212_v17  ;;  %431 = vmatprep.mubr.msk.f32.mxu0 %vm487_vm3, %v488_v23  ;;  %p470_p4 = pnand %p469_p3, %p463_p0 }
  0x10   :  { %201 = vadd.xlane.f32.xlu0 %v200_v18  ;;  %447 = vmatprep.subr.bf16.mxu1 %v544_v13 }
  0x12   :  { %449 = vmatpush3.bf16.msra.mxu1 %v544_v13 }
  0x14   :  { %453 = vmatpush3.bf16.xpose.msk.msra.mxu0 %vm452_vm2, %v451_v21 }
  0x15   :  { %425 = vmatmul.mubr.msk.f32.vlgmr.msra.gmra.mrb[0].mxu1 %vm24_vm1, %v23_v20 }
  0x90   :  { %v205_v26 = vpop.xlane.xlu1 %204 }
  0x91   :  { %v193_v27 = vpop.xlane.xlu0 %192  ;;  %v253_v44 = vrot.slane %v205_v26, %v227_v36 }
  0x92   :  { %v228_v45 = vrot.slane %v193_v27, %v227_v36 }
  0x94   :  { %v208_v31 = vpop.xlane.xlu1 %207 }
  0x95   :  { %v196_v32 = vpop.xlane.xlu0 %195  ;;  %v257_v39 = vrot.slane %v208_v31, %v232_v33 }
  0x96   :  { %v233_v40 = vrot.slane %v196_v32, %v232_v33 }
  0x97   :  { %v258_v48 = vsel %vm234_vm4, %v257_v39, %v253_v44 }
  0x98   :  { %v211_v37 = vpop.xlane.xlu1 %210  ;;  %v235_v49 = vsel %vm234_vm4, %v233_v40, %v228_v45 }
  0x99   :  { %v199_v38 = vpop.xlane.xlu0 %198  ;;  %v262_v42 = vrot.slane %v211_v37, %v239_v35 }
  0x9a   :  { %v240_v43 = vrot.slane %v199_v38, %v239_v35 }
  0x9b   :  { %v263_v52 = vsel %vm241_vm5, %v262_v42, %v258_v48 }
  0x9c   :  { %v214_v46 = vpop.xlane.xlu1 %213  ;;  %v242_v53 = vsel %vm241_vm5, %v240_v43, %v235_v49 }
  0x9d   :  { %v202_v47 = vpop.xlane.xlu0 %201  ;;  %v267_v50 = vrot.slane %v214_v46, %v246_v41 }
  0x9e   :  { %v247_v51 = vrot.slane %v202_v47, %v246_v41 }
  0x9f   :  { %v268_v54 = vsel %vm248_vm6, %v267_v50, %v263_v52 }
  0xa0   :  { %v249_v55 = vsel %vm248_vm6, %v247_v51, %v242_v53 }
  0xa1   :  { %v270_v56 = vsel %vm269_vm7, %v268_v54, %v249_v55 }
  0xa2   :  { %432 = vmatmul.mubr.msk.f32.vlgmr.msra.gmra.mrb[2].mxu0 %vm24_vm1, %v270_v56 }
  0xe1   :  { %v415_v57 = vpop.f32.mrb[0].mxu0 }
  0xe2   :  { %v107_v58 = vmul.f32 0.015625, %v415_v57  ;;  %v97_v59 = vpop.f32.mrb[1].mxu0 }
  0xe3   :  { %v106_v60 = vmul.f32 0.015625, %v97_v59 }
  0xe4   :  { %110 = vst.msk [vmem:[%s600_s2 + $0x8] sm:$0xff] %vm108_vm0, %v107_v58 }
  0xe5   :  { %109 = vst.msk [vmem:[%s600_s2] sm:$0xff] %vm108_vm0, %v106_v60 }
  0xe8   :  { %v426_v7 = vpop.f32.mrb[0].mxu1 }
  0xe9   :  { %v187_v8 = vmul.f32 0.015625, %v426_v7  ;;  %v177_v9 = vpop.f32.mrb[1].mxu1 }
  0xea   :  { %v186_v10 = vmul.f32 0.015625, %v177_v9 }
  0xeb   :  { %386 = vst.msk [vmem:[%s600_s2 + $0x18] sm:$0xff] %vm108_vm0, %v187_v8 }
  0xec   :  { %385 = vst.msk [vmem:[%s600_s2 + $0x10] sm:$0xff] %vm108_vm0, %v186_v10 }
 0x175   :  { %v339_v62 = vpop.f32.mrb[2].mxu0 }
 0x176   :  { %v343_v63 = vmul.f32 0.015625, %v339_v62  ;;  %v433_v1 = vpop.f32.mrb[3].mxu0 }
 0x178   :  { %v345_v3 = vsel %vm344_vm8, %v343_v63, -inf }
 0x179   :  { %346 = vmax.xlane.f32.xlu0 %v345_v3 }
 0x206   :  { %v347_v4 = vpop.xlane.xlu0 %346 }
 0x207   :  { %v348_v5 = vsub.f32 %v343_v63, %v347_v4 }
 0x209   :  { %v349_v6 = vmul.f32 1.442695, %v348_v5 }
 0x20b   :  { %458 = vpow2.f32 %v349_v6 }
 0x215   :  { %v459_v0 = vpop.eup %458 }
 0x216   :  { %v351_v2 = vsel %vm344_vm8, %v459_v0, 0.0 }
 0x217   :  { %352 = vadd.xlane.f32.xlu1 %v351_v2 }
 0x2a4   :  { %v353_v11 = vpop.xlane.xlu1 %352 }
 0x2a5   :  { %460 = vrcp.f32 %v353_v11 }
 0x2af   :  { %v461_v12 = vpop.eup %460 }
 0x2b0   :  { %v355_v13 = vmul.f32 %v461_v12, %v353_v11 }
 0x2b2   :  { %v356_v14 = vsub.f32 2.0, %v355_v13 }
 0x2b4   :  { %v357_v15 = vmul.f32 %v461_v12, %v356_v14 }
 0x2b6   :  { %v358_v16 = vmul.f32 %v357_v15, %v353_v11 }
 0x2b8   :  { %v359_v17 = vsub.f32 2.0, %v358_v16 }
 0x2ba   :  { %v360_v18 = vmul.f32 %v359_v17, %v357_v15 }
 0x2bc   :  { %v361_v19 = vmul.f32 %v459_v0, %v360_v18 }
 0x2be   :  { %362 = vst.msk [vmem:[#allocation2] sm:$0x3] %vm344_vm8, %v361_v19 }
 0x2bf   :  { %473 = shalt.err (!%p470_p4)
}
 0x2c0   :  { %s474_s15 = scalar_lea.hbm %s601_s3, 32 }
 0x2c1   :  { %p475_p5 = scmp.ne.s32.totalorder %s601_s3, %s474_s15  ;;  %p478_p6 = scmp.lt.u32.totalorder %s474_s15, %s601_s3 }
 0x2c3   :  { %p480_p7 = pnand %p478_p6, %p475_p5 }
 0x2c5   :  { %483 = shalt.err (!%p480_p7)
}
 0x2c6   :  { %374 = dma.vmem_to_hbm [thread:$0]  %s372_s12, 32, %s601_s3, [#allocation3]  }
 0x2c7   :  { %484 = dma.done.wait [#allocation3], 32  }
 0x2c8   :  { %485 = vsyncadd [#allocation3], 4294967264 }
 0x2c9   :  { %380 = vsyncpa [#allocation3], 1 }

</bundles_post_ra>
